<compile_context>
chip_gen: v7x
topology: tpu7x:2x2x1
jax: 0.10.0
libtpu: 0.0.40
codegen_flags: <defaults>
</compile_context>

<pallas_src>
import jax
import jax.numpy as jnp
from jax.experimental import pallas as pl
from jax.experimental.pallas import tpu as pltpu


def _round_up(n: int, m: int) -> int:
    return ((n + m - 1) // m) * m


def adapter_kernel(x_ref, w1_ref, b1_ref, w2_ref, b2_ref, o_ref):
    # x_ref:  (tm, E)   row tile (native dtype)
    # w1_ref: (E, Bn)   full down-projection weight (VMEM-resident)
    # b1_ref: (1, Bn)
    # w2_ref: (Bn, E)   full up-projection weight (VMEM-resident)
    # b2_ref: (1, E)

    # Down-projection on the MXU in the input dtype; f32 accumulate.
    h = jnp.dot(x_ref[...], w1_ref[...], preferred_element_type=jnp.float32)
    # Bias + ReLU in f32 on the (small) (tm, Bn) intermediate.
    h = jnp.maximum(h + b1_ref[...].astype(jnp.float32), 0.0)

    # Up-projection: cast only the small intermediate back to the weight dtype
    # so bf16 weights keep full MXU rate; f32 accumulate.
    y = jnp.dot(h.astype(w2_ref.dtype), w2_ref[...],
                preferred_element_type=jnp.float32)
    y = y + b2_ref[...].astype(jnp.float32)

    # Residual: re-read x from the VMEM ref (no extra HBM traffic, short live
    # range), add in f32, cast on store.
    o_ref[...] = (x_ref[...].astype(jnp.float32) + y).astype(o_ref.dtype)


def adapter_layer(x, w1, b1, w2, b2, *, tm_max=512):
    """x: (batch, seq, emb). w1: (E, Bn), b1: (Bn,), w2: (Bn, E), b2: (E,).

    Weights are stored (in_features, out_features), i.e. transposed relative
    to PyTorch nn.Linear, so the kernel runs plain row-major matmuls.
    """
    batch, seq, emb = x.shape
    bn = w1.shape[1]
    M = batch * seq

    # Lane-dense feature dims: pad emb and bottleneck up to multiples of 128.
    E_pad = _round_up(emb, 128)
    Bn_pad = _round_up(bn, 128)

    # Sublane unit for the row tile (8 for 4-byte, 16 for 2-byte dtypes).
    unit = 8 if jnp.dtype(x.dtype).itemsize >= 4 else 16

    # Row tile: as large as useful, aligned to the sublane unit.
    tm = min(_round_up(tm_max, unit), _round_up(M, unit))

    # Prefer >=2 grid steps so both v7x TensorCores get work.
    if _round_up(M, tm) // tm < 2 and tm >= 2 * unit:
        tm_half = _round_up(tm // 2, unit)
        if _round_up(M, tm_half) // tm_half >= 2:
            tm = tm_half

    # VMEM budget: double-buffered x/out tiles + single-buffered weights +
    # f32 intermediates must fit comfortably under the scoped limit.
    vmem_limit = 64 * 1024 * 1024
    x_bytes = jnp.dtype(x.dtype).itemsize
    w_bytes = jnp.dtype(w1.dtype).itemsize

    def _est(tm_):
        act = 2 * 2 * tm_ * E_pad * x_bytes                      # x + out, 2-deep
        wts = (2 * E_pad * Bn_pad + Bn_pad + E_pad) * w_bytes    # resident weights
        tmp = tm_ * (Bn_pad + 2 * E_pad) * 4                     # f32 intermediates
        return act + wts + tmp

    while tm > unit and _est(tm) > int(0.75 * vmem_limit):
        tm = _round_up(tm // 2, unit)

    M_pad = _round_up(M, tm)
    grid = M_pad // tm

    # Host-side zero padding (exact: padded rows/cols contribute 0 everywhere).
    x2 = x.reshape(M, emb)
    x2 = jnp.pad(x2, ((0, M_pad - M), (0, E_pad - emb)))
    w1p = jnp.pad(w1, ((0, E_pad - emb), (0, Bn_pad - bn)))
    b1p = jnp.pad(b1, ((0, Bn_pad - bn),)).reshape(1, Bn_pad)
    w2p = jnp.pad(w2, ((0, Bn_pad - bn), (0, E_pad - emb)))
    b2p = jnp.pad(b2, ((0, E_pad - emb),)).reshape(1, E_pad)

    out = pl.pallas_call(
        adapter_kernel,
        out_shape=jax.ShapeDtypeStruct((M_pad, E_pad), x.dtype),
        grid=(grid,),
        in_specs=[
            pl.BlockSpec((tm, E_pad), lambda i: (i, 0)),              # x rows tile
            pl.BlockSpec(memory_space=pltpu.MemorySpace.VMEM),        # W1 (resident)
            pl.BlockSpec(memory_space=pltpu.MemorySpace.VMEM),        # b1
            pl.BlockSpec(memory_space=pltpu.MemorySpace.VMEM),        # W2 (resident)
            pl.BlockSpec(memory_space=pltpu.MemorySpace.VMEM),        # b2
        ],
        out_specs=pl.BlockSpec((tm, E_pad), lambda i: (i, 0)),
        compiler_params=pltpu.CompilerParams(
            dimension_semantics=("parallel",),
            vmem_limit_bytes=vmem_limit,
        ),
    )(x2, w1p, b1p, w2p, b2p)

    return out[:M, :emb].reshape(batch, seq, emb)


def reference(x, w1, b1, w2, b2):
    h = jnp.maximum(x @ w1 + b1, 0.0)
    return x + (h @ w2 + b2)


if __name__ == "__main__":
    batch, seq, emb_dim, bottleneck = 2, 8, 32, 16

    key = jax.random.PRNGKey(0)
    kx, kw1, kb1, kw2, kb2 = jax.random.split(key, 5)

    x = jax.random.normal(kx, (batch, seq, emb_dim), dtype=jnp.float32)

    # Deterministic parameter init (uniform, like torch.nn.Linear's default scale).
    bound1 = 1.0 / (emb_dim ** 0.5)
    w1 = jax.random.uniform(kw1, (emb_dim, bottleneck), jnp.float32, -bound1, bound1)
    b1 = jax.random.uniform(kb1, (bottleneck,), jnp.float32, -bound1, bound1)
    bound2 = 1.0 / (bottleneck ** 0.5)
    w2 = jax.random.uniform(kw2, (bottleneck, emb_dim), jnp.float32, -bound2, bound2)
    b2 = jax.random.uniform(kb2, (emb_dim,), jnp.float32, -bound2, bound2)

    out = adapter_layer(x, w1, b1, w2, b2)
    out = jax.block_until_ready(out)

    ref = reference(x, w1, b1, w2, b2)
    assert out.shape == x.shape
    assert jnp.allclose(out, ref, atol=1e-5, rtol=1e-5), "mismatch vs reference"

    print("KERNEL_OK")
</pallas_src>

<mosaic_0001>
module attributes {stable_mosaic.version = 11 : i64} {
  func.func @adapter_kernel(%arg0: i32, %arg1: memref<8x128xf32, #tpu.memory_space<vmem>>, %arg2: memref<128x128xf32, #tpu.memory_space<vmem>>, %arg3: memref<1x128xf32, #tpu.memory_space<vmem>>, %arg4: memref<128x128xf32, #tpu.memory_space<vmem>>, %arg5: memref<1x128xf32, #tpu.memory_space<vmem>>, %arg6: memref<8x128xf32, #tpu.memory_space<vmem>>) attributes {dimension_semantics = [#tpu.dimension_semantics<parallel>], iteration_bounds = array<i64: 2>, scalar_prefetch = 0 : i64, scratch_operands = 0 : i64, tpu.core_type = #tpu.core_type<tc>, window_params = [{transform_indices = @transform_0, window_bounds = array<i64: 8, 128>}, {pipeline_mode = #tpu.pipeline_mode<synchronous>, transform_indices = @transform_1, window_bounds = array<i64: 128, 128>}, {pipeline_mode = #tpu.pipeline_mode<synchronous>, transform_indices = @transform_2, window_bounds = array<i64: 1, 128>}, {pipeline_mode = #tpu.pipeline_mode<synchronous>, transform_indices = @transform_3, window_bounds = array<i64: 128, 128>}, {pipeline_mode = #tpu.pipeline_mode<synchronous>, transform_indices = @transform_4, window_bounds = array<i64: 1, 128>}, {transform_indices = @transform_5, window_bounds = array<i64: 8, 128>}]} {
    %c0 = arith.constant 0 : index
    %c0_0 = arith.constant 0 : index
    %0 = vector.load %arg1[%c0, %c0_0] : memref<8x128xf32, #tpu.memory_space<vmem>>, vector<8x128xf32>
    %c0_1 = arith.constant 0 : index
    %c0_2 = arith.constant 0 : index
    %1 = vector.load %arg2[%c0_1, %c0_2] : memref<128x128xf32, #tpu.memory_space<vmem>>, vector<128x128xf32>
    %cst = arith.constant dense<0.000000e+00> : vector<8x128xf32>
    %2 = tpu.matmul %0, %1, %cst {dimension_numbers = #tpu.dot_dimension_numbers<[1], [0], [0], [1], [0, 0, 1, 1], [], []>} : vector<8x128xf32>, vector<128x128xf32>, vector<8x128xf32> -> vector<8x128xf32>
    %c0_3 = arith.constant 0 : index
    %c0_4 = arith.constant 0 : index
    %3 = vector.load %arg3[%c0_3, %c0_4] : memref<1x128xf32, #tpu.memory_space<vmem>>, vector<1x128xf32>
    %4 = vector.broadcast %3 : vector<1x128xf32> to vector<8x128xf32>
    %5 = arith.addf %2, %4 : vector<8x128xf32>
    %cst_5 = arith.constant 0.000000e+00 : f32
    %6 = vector.broadcast %cst_5 : f32 to vector<8x128xf32>
    %7 = arith.maximumf %5, %6 : vector<8x128xf32>
    %c0_6 = arith.constant 0 : index
    %c0_7 = arith.constant 0 : index
    %8 = vector.load %arg4[%c0_6, %c0_7] : memref<128x128xf32, #tpu.memory_space<vmem>>, vector<128x128xf32>
    %cst_8 = arith.constant dense<0.000000e+00> : vector<8x128xf32>
    %9 = tpu.matmul %7, %8, %cst_8 {dimension_numbers = #tpu.dot_dimension_numbers<[1], [0], [0], [1], [0, 0, 1, 1], [], []>} : vector<8x128xf32>, vector<128x128xf32>, vector<8x128xf32> -> vector<8x128xf32>
    %c0_9 = arith.constant 0 : index
    %c0_10 = arith.constant 0 : index
    %10 = vector.load %arg5[%c0_9, %c0_10] : memref<1x128xf32, #tpu.memory_space<vmem>>, vector<1x128xf32>
    %11 = vector.broadcast %10 : vector<1x128xf32> to vector<8x128xf32>
    %12 = arith.addf %9, %11 : vector<8x128xf32>
    %c0_11 = arith.constant 0 : index
    %c0_12 = arith.constant 0 : index
    %13 = vector.load %arg1[%c0_11, %c0_12] : memref<8x128xf32, #tpu.memory_space<vmem>>, vector<8x128xf32>
    %14 = arith.addf %13, %12 : vector<8x128xf32>
    %c0_13 = arith.constant 0 : index
    %c0_14 = arith.constant 0 : index
    %15 = vector.load %arg6[%c0_13, %c0_14] : memref<8x128xf32, #tpu.memory_space<vmem>>, vector<8x128xf32>
    tpu.vector_store %arg6[%c0_13, %c0_14], %14 {strides = array<i32>} : memref<8x128xf32, #tpu.memory_space<vmem>>, vector<8x128xf32>,
    return
  }
  func.func @transform_0(%arg0: i32) -> (i32, i32) {
    %c0_i32 = arith.constant 0 : i32
    %c0_i32_0 = arith.constant 0 : i32
    return %arg0, %c0_i32 : i32, i32
  }
  func.func @transform_1(%arg0: i32) -> (i32, i32) {
    %c0_i32 = arith.constant 0 : i32
    %c0_i32_0 = arith.constant 0 : i32
    %c0_i32_1 = arith.constant 0 : i32
    return %c0_i32, %c0_i32_0 : i32, i32
  }
  func.func @transform_2(%arg0: i32) -> (i32, i32) {
    %c0_i32 = arith.constant 0 : i32
    %c0_i32_0 = arith.constant 0 : i32
    %c0_i32_1 = arith.constant 0 : i32
    return %c0_i32, %c0_i32_0 : i32, i32
  }
  func.func @transform_3(%arg0: i32) -> (i32, i32) {
    %c0_i32 = arith.constant 0 : i32
    %c0_i32_0 = arith.constant 0 : i32
    %c0_i32_1 = arith.constant 0 : i32
    return %c0_i32, %c0_i32_0 : i32, i32
  }
  func.func @transform_4(%arg0: i32) -> (i32, i32) {
    %c0_i32 = arith.constant 0 : i32
    %c0_i32_0 = arith.constant 0 : i32
    %c0_i32_1 = arith.constant 0 : i32
    return %c0_i32, %c0_i32_0 : i32, i32
  }
  func.func @transform_5(%arg0: i32) -> (i32, i32) {
    %c0_i32 = arith.constant 0 : i32
    %c0_i32_0 = arith.constant 0 : i32
    return %arg0, %c0_i32 : i32, i32
  }
}

</mosaic_0001>

<bundles_post_ra>
// kernel: tpu_custom_call.1
= control target key start
LH: loop header
LB: loop body
LE: loop exit
PB: predicated region body
PF: predicated region fallthrough
CT: control target
= control target key end

     0   :  { %10 = vsyncpa [#allocation3], 0  ;;  %s1435_s0 = inlined_call_operand.hbm [shape: f32[16,128], index: 0, kind: input, shape index: {}]   ;;  %s1436_s1 = inlined_call_operand.hbm [shape: f32[128,128], index: 1, kind: input, shape index: {}]   ;;  %s1437_s2 = inlined_call_operand.hbm [shape: f32[1,128], index: 2, kind: input, shape index: {}]   ;;  %s1438_s3 = inlined_call_operand.hbm [shape: f32[128,128], index: 3, kind: input, shape index: {}]   ;;  %s1439_s4 = inlined_call_operand.hbm [shape: f32[1,128], index: 4, kind: input, shape index: {}]   ;;  %s1440_s5 = inlined_call_operand.hbm [shape: f32[16,128], index: 5, kind: output, shape index: {}]  }
   0x1   :  { %12 = vsyncpa [#allocation3 + $0x1], 0 }
   0x2   :  { %13 = vsyncpa [#allocation6], 0 }
   0x3   :  { %14 = vsyncpa [#allocation9], 0 }
   0x4   :  { %15 = vsyncpa [#allocation4], 0 }
   0x5   :  { %17 = vsyncpa [#allocation4 + $0x1], 0  ;;  %s1131_s18 = smov 0   ;;  %s1133_s19 = smov 0  }
   0x6   :  { %s1135_s20 = smov 0   ;;  %s1137_s21 = smov 0  }
   0x7 LB: > { %s1090_s22 = smov [#allocation5]   ;;  %s1152_s24 = sadd.s32 4294967295, %s1088_s21   ;;  %s1088_s21 = sphi %s1137_s21, %s1464_s21   ;;  %s1084_s20 = sphi %s1135_s20, %s1463_s20   ;;  %s1080_s19 = sphi %s1133_s19, %s1462_s19   ;;  %s1076_s18 = sphi %s1131_s18, %s1461_s18  }
   0x8   : > { %s176_s23 = sshll.u32 %s1090_s22, 4  ;;  %p607_p0 = scmp.ge.s32.totalorder %s1088_s21, 1  ;;  %s1157_s23 = int_to_ptr.vmem [resolvable:$true] %s176_s23 }
   0x9   : > { %p1441_p1 = scmp.eq.s32.totalorder %s1152_s24, 0  ;;  %p164_p2 = scmp.lt.s32.totalorder %s1088_s21, 3 }
   0xa   : > { %s1091_s26 = smov [#allocation8]   ;;  %s1092_s29 = smov [#allocation7]  }
   0xb   : > { %p1159_p3 = pnand %p607_p0, %p164_p2  ;;  %s200_s27 = sshll.u32 %s1091_s26, 4  ;;  %s1172_s27 = int_to_ptr.vmem [resolvable:$true] %s200_s27 }
   0xc   : > { %s190_s30 = sshll.u32 %s1092_s29, 4  ;;  %s872_s8 = scalar_lea.hbm %s1436_s1, 2048  ;;  %s1174_s30 = int_to_ptr.vmem [resolvable:$true] %s190_s30 }
   0xd   : > { %s1444_s25 = scalar_select %p1159_p3, 1, 0 }
   0xe   : > { %p800_p5 = pneg %p1159_p3  ;;  %p873_p7 = scmp.ne.s32.totalorder %s1436_s1, %s872_s8 }
   0xf   : > { %p879_p11 = scmp.lt.u32.totalorder %s872_s8, %s1436_s1 }
  0x10   : > { %p1168_p6 = pnand %p800_p5, %p1441_p1 }
  0x12   : > { %p1184_p8 = pneg %p1168_p6 }
  0x14   : > { %p875_p9 = pnand %p1184_p8, %p873_p7 }
  0x16   : > { %p876_p10 = pneg %p875_p9 }
  0x18   : > { %p881_p12 = pnand %p879_p11, %p876_p10 }
  0x1a   : > { %884 = shalt.err (!%p881_p12)
}
  0x1b   : > { %s885_s14 = scalar_lea.vmem %s1157_s23, 2048  ;;  %p893_p5 = scmp.lt.s32.totalorder %s1157_s23, %s1157_s23 }
  0x1c   : > { %p886_p13 = scmp.ne.s32.totalorder %s1157_s23, %s885_s14  ;;  %p894_p4 = scmp.lt.s32.totalorder %s885_s14, %s885_s14 }
  0x1e   : > { %p888_p0 = pnand %p886_p13, %p1184_p8  ;;  %p895_p7 = por %p894_p4, %p893_p5 }
  0x20   : > { %p889_p2 = pneg %p888_p0 }
  0x22   : > { %p896_p9 = pnand %p895_p7, %p889_p2 }
  0x24   : > { %899 = shalt.err (!%p896_p9)
}
  0x25   : > { %s1093_s15 = smov 128   ;;  %s1094_s16 = smov 8  }
  0x26   : > { %803 = dma.hbm_to_vmem [thread:$0]  (!%p1168_p6), %s1436_s1, 2048, %s1157_s23, [#allocation6], %s1093_s15, %s1093_s15, %s1094_s16  }
  0x27   : > { %s900_s6 = scalar_lea.hbm %s1438_s3, 2048 }
  0x28   : > { %p901_p4 = scmp.ne.s32.totalorder %s1438_s3, %s900_s6  ;;  %p907_p12 = scmp.lt.u32.totalorder %s900_s6, %s1438_s3 }
  0x2a   : > { %p903_p10 = pnand %p901_p4, %p1184_p8 }
  0x2c   : > { %p904_p11 = pneg %p903_p10 }
  0x2e   : > { %p909_p13 = pnand %p907_p12, %p904_p11 }
  0x30   : > { %912 = shalt.err (!%p909_p13)
}
  0x31   : > { %s913_s23 = scalar_lea.vmem %s1172_s27, 2048  ;;  %p921_p7 = scmp.lt.s32.totalorder %s1172_s27, %s1172_s27 }
  0x32   : > { %p914_p0 = scmp.ne.s32.totalorder %s1172_s27, %s913_s23  ;;  %p922_p9 = scmp.lt.s32.totalorder %s913_s23, %s913_s23 }
  0x34   : > { %p916_p2 = pnand %p914_p0, %p1184_p8  ;;  %p923_p4 = por %p922_p9, %p921_p7 }
  0x36   : > { %p917_p5 = pneg %p916_p2 }
  0x38   : > { %p924_p10 = pnand %p923_p4, %p917_p5 }
  0x3a   : > { %927 = shalt.err (!%p924_p10)
}
  0x3b   : > { %809 = dma.hbm_to_vmem [thread:$0]  (!%p1168_p6), %s1438_s3, 2048, %s1172_s27, [#allocation9], %s1093_s15, %s1093_s15, %s1094_s16  }
  0x3c   : > { %s928_s22 = scalar_lea.hbm %s1437_s2, 16 }
  0x3d   : > { %p929_p11 = scmp.ne.s32.totalorder %s1437_s2, %s928_s22  ;;  %p935_p0 = scmp.lt.u32.totalorder %s928_s22, %s1437_s2 }
  0x3f   : > { %p931_p12 = pnand %p929_p11, %p1184_p8 }
  0x41   : > { %p932_p13 = pneg %p931_p12 }
  0x43   : > { %p937_p2 = pnand %p935_p0, %p932_p13 }
  0x45   : > { %940 = shalt.err (!%p937_p2)
}
  0x46   : > { %s941_s27 = scalar_lea.vmem %s1174_s30, 16  ;;  %s948_s15 = scalar_lea.vmem %s1174_s30, 32 }
  0x47   : > { %p942_p5 = scmp.ne.s32.totalorder %s1174_s30, %s941_s27  ;;  %p949_p4 = scmp.lt.s32.totalorder %s1174_s30, %s1174_s30 }
  0x48   : > { %p950_p10 = scmp.lt.s32.totalorder %s948_s15, %s941_s27 }
  0x49   : > { %p944_p7 = pnand %p942_p5, %p1184_p8 }
  0x4a   : > { %p951_p11 = por %p950_p10, %p949_p4 }
  0x4b   : > { %p945_p9 = pneg %p944_p7 }
  0x4d   : > { %p952_p12 = pnand %p951_p11, %p945_p9 }
  0x4f   : > { %955 = shalt.err (!%p952_p12)
}
  0x50   : > { %806 = dma.hbm_to_vmem [thread:$0]  (!%p1168_p6), %s1437_s2, 16, %s1174_s30, [#allocation6]  }
  0x51   : > { %s1095_s9 = smov [#allocation10]   ;;  %s956_s13 = scalar_lea.hbm %s1439_s4, 16 }
  0x52   : > { %s214_s10 = sshll.u32 %s1095_s9, 4  ;;  %p957_p13 = scmp.ne.s32.totalorder %s1439_s4, %s956_s13  ;;  %s215_s10 = int_to_ptr.vmem [resolvable:$true] %s214_s10 }
  0x53   : > { %p963_p5 = scmp.lt.u32.totalorder %s956_s13, %s1439_s4 }
  0x54   : > { %p959_p0 = pnand %p957_p13, %p1184_p8 }
  0x56   : > { %p960_p2 = pneg %p959_p0 }
  0x58   : > { %p965_p7 = pnand %p963_p5, %p960_p2 }
  0x5a   : > { %968 = shalt.err (!%p965_p7)
}
  0x5b   : > { %s969_s30 = scalar_lea.vmem %s215_s10, 16  ;;  %s976_s29 = scalar_lea.vmem %s215_s10, 32 }
  0x5c   : > { %p970_p9 = scmp.ne.s32.totalorder %s215_s10, %s969_s30  ;;  %p977_p11 = scmp.lt.s32.totalorder %s215_s10, %s215_s10 }
  0x5d   : > { %p978_p12 = scmp.lt.s32.totalorder %s976_s29, %s969_s30 }
  0x5e   : > { %p972_p4 = pnand %p970_p9, %p1184_p8 }
  0x5f   : > { %p979_p1 = por %p978_p12, %p977_p11 }
  0x60   : > { %p973_p10 = pneg %p972_p4 }
  0x62   : > { %p980_p3 = pnand %p979_p1, %p973_p10 }
  0x64   : > { %983 = shalt.err (!%p980_p3)
}
  0x65   : > { %812 = dma.hbm_to_vmem [thread:$0]  (!%p1168_p6), %s1439_s4, 16, %s215_s10, [#allocation9]  }
  0x66   : > { %s606_s11 = sadd.s32 4294967294, %s1088_s21   ;;  %s1272_s28 = sadd.s32 1, %s1088_s21  }
  0x67   : > { %s27_s27 = ssub.s32 %s1088_s21, %s1272_s28  ;;  %s30_s15 = sadd.s32 1, %s1084_s20 }
  0x68   : > { %p28_p1 = scmp.eq.s32.totalorder %s27_s27, 0  ;;  %p37_p3 = scmp.ne.s32.totalorder %s1084_s20, %s1080_s19 }
  0x69   : > { %p38_p8 = scmp.eq.s32.totalorder %s1088_s21, 0  ;;  %p43_p13 = scmp.ne.s32.totalorder %s1080_s19, %s1076_s18 }
  0x6a   : > { %s1283_s16 = scalar_select %p28_p1, %s1084_s20, %s30_s15  }
  0x6b   : > { %p1285_p0 = por %p38_p8, %p37_p3  ;;  %p1448_p2 = scmp.eq.s32.totalorder %s1152_s24, 0 }
  0x6c   : > { %p151_p5 = scmp.eq.s32.totalorder %s1152_s24, 1  ;;  %p157_p7 = scmp.eq.s32.totalorder %s606_s11, 1 }
  0x6d   : > { %p1291_p6 = por %p1448_p2, %p43_p13  ;;  %p825_p9 = scmp.lt.s32.totalorder %s1088_s21, 2 }
  0x6e   : > { %s225_s10 = sand.u32 1, %s1084_s20   ;;  %p1298_p4 = por %p151_p5, %p37_p3 }
  0x6f   : > { %p1302_p10 = por %p157_p7, %p43_p13  ;;  %s613_s13 = sshll.u32 %s225_s10, 3 }
  0x70   : > { %s1450_s23 = scalar_select %p1298_p4, 1, 0 }
  0x71   : > { %s1451_s12 = scalar_select %p1302_p10, 1, 0 }
  0x72   : > { %s614_s14 = sshll.u32 %s1088_s21, 7  ;;  %s229_s30 = scalar_lea.vmem [#allocation2], %s613_s13 }
  0x73   : > { %s1310_s26 = scalar_lea.hbm %s1435_s0, %s614_s14  ;;  %s236_s29 = sshll.u32 %s229_s30, 4  ;;  %s1312_s29 = int_to_ptr.vmem [resolvable:$true] %s236_s29 }
  0x74   : > { %p1316_p11 = pnand %p825_p9, %p1285_p0  ;;  %s226_s7 = scalar_lea.sflag [#allocation3], %s225_s10 }
  0x75   : > { %s984_s11 = scalar_lea.hbm %s1310_s26, 128  ;;  %s989_s13 = scalar_lea.hbm %s1435_s0, 256 }
  0x76   : > { %p985_p12 = scmp.ne.s32.totalorder %s1310_s26, %s984_s11  ;;  %p986_p1 = pneg %p1316_p11 }
  0x77   : > { %p990_p13 = scmp.lt.u32.totalorder %s1310_s26, %s1435_s0  ;;  %p991_p0 = scmp.lt.u32.totalorder %s989_s13, %s984_s11 }
  0x78   : > { %p987_p3 = pnand %p986_p1, %p985_p12  ;;  %p993_p5 = scmp.lt.u32.totalorder %s984_s11, %s1310_s26 }
  0x79   : > { %p992_p2 = por %p991_p0, %p990_p13 }
  0x7a   : > { %p988_p8 = pneg %p987_p3 }
  0x7b   : > { %p994_p7 = por %p993_p5, %p992_p2 }
  0x7d   : > { %p995_p9 = pnand %p994_p7, %p988_p8 }
  0x7f   : > { %998 = shalt.err (!%p995_p9)
}
  0x80   : > { %s999_s10 = scalar_lea.vmem %s1312_s29, 128  ;;  %s1096_s17 = smov [#allocation2]  }
  0x81   : > { %p1000_p12 = scmp.ne.s32.totalorder %s1312_s29, %s999_s10  ;;  %s1004_s22 = sshll.u32 %s1096_s17, 4  ;;  %s1005_s22 = int_to_ptr.vmem [resolvable:$false] %s1004_s22 }
  0x82   : > { %s1006_s30 = scalar_lea.vmem %s1005_s22, 256  ;;  %p1007_p4 = scmp.lt.s32.totalorder %s1312_s29, %s1005_s22 }
  0x83   : > { %p1002_p3 = pnand %p1000_p12, %p986_p1  ;;  %p1008_p13 = scmp.lt.s32.totalorder %s1006_s30, %s999_s10 }
  0x85   : > { %p1003_p10 = pneg %p1002_p3  ;;  %p1009_p0 = por %p1008_p13, %p1007_p4 }
  0x87   : > { %p1010_p2 = pnand %p1009_p0, %p1003_p10 }
  0x89   : > { %1013 = shalt.err (!%p1010_p2)
}
  0x8a   : > { %816 = dma.hbm_to_vmem [thread:$0]  (!%p1316_p11), %s1310_s26, 128, %s1312_s29, %s226_s7  }
  0x8b   : > { %p1453_p8 = scmp.ne.s32.totalorder %s1444_s25, 0 }
  0x8c   : > { %s1348_s11 = sand.u32 (!%p1453_p8), 1, %s1080_s19  }
  0x8d   : > { %245 = sbr.rel (%p1453_p8) target bundleno = 635 (0x27b), region = 40  ;;  %s616_s27 = sshll.u32 (!%p1453_p8), %s1348_s11, 3 }
  0x8e   : > { %s248_s15 = scalar_lea.sflag (!%p1453_p8), [#allocation3], %s1348_s11  ;;  %s1354_s13 = scalar_lea.vmem (!%p1453_p8), [#allocation2], %s616_s27 }
  0x94   : > { %1059 = dma.done.wait (%p1291_p6), %s248_s15, 128  }
  0x95   : > { %1061 = vsyncadd (%p1291_p6), %s248_s15, 4294967168  ;;  %p1454_p4 = scmp.eq.s32.totalorder %s1152_s24, 0 }
  0x97   : > { %1063 = dma.done.wait (%p1454_p4), [#allocation6], 2064   ;;  %p1455_p10 = pmov %p1454_p4 }
  0x98   : > { %p1456_p11 = pmov %p1454_p4 }
  0x99   : > { %1065 = vsyncadd (%p1455_p10), [#allocation6], 4294965232 }
  0x9a   : > { %1067 = dma.done.wait (%p1456_p11), [#allocation9], 2064   ;;  %p1457_p1 = pmov %p1454_p4 }
  0x9b   : > { %v1097_v0 = vmov 0.0|0.0   ;;  %vm1098_vm0 = vmmov 0   ;;  %v1099_v1 = vmov 0.0   ;;  %v295_v2 = vld [vmem:[#allocation5] sm:$0xff]  ;;  %v296_v3 = vld [vmem:[#allocation5 + $0x8] sm:$0xff]  ;;  %v297_v4 = vld [vmem:[#allocation5 + $0x10] sm:$0xff] }
  0x9c   : > { %1069 = vsyncadd (%p1457_p1), [#allocation9], 4294965232  ;;  %732 = vmatprep.subr.bf16.mxu0 %v1097_v0  ;;  %694 = vmatprep.mubr.msk.f32.mxu0 %vm1098_vm0, %v1099_v1  ;;  %v733_v5 = vpack.c.bf16 %v296_v3, %v295_v2  ;;  %v298_v6 = vld [vmem:[#allocation5 + $0x18] sm:$0xff]  ;;  %v299_v8 = vld [vmem:[#allocation5 + $0x20] sm:$0xff]  ;;  %s625_s25 = sshll.u32 %s1152_s24, 7  ;;  %s293_s9 = scalar_lea.vmem [#allocation11], %s616_s27 }
  0x9d   : > { %756 = vmatprep.subr.bf16.mxu1 %v1097_v0  ;;  %729 = vmatprep.mubr.msk.f32.mxu1 %vm1098_vm0, %v1099_v1  ;;  %v736_v7 = vpack.c.bf16 %v298_v6, %v297_v4  ;;  %v300_v9 = vld [vmem:[#allocation5 + $0x28] sm:$0xff]  ;;  %v391_v12 = vld [vmem:[#allocation8 + $0x10] sm:$0xff]  ;;  %v392_v13 = vld [vmem:[#allocation8 + $0x18] sm:$0xff]  ;;  %s498_s26 = sshll.u32 %s293_s9, 4  ;;  %s1391_s7 = scalar_lea.hbm %s1440_s5, %s625_s25  ;;  %s1393_s26 = int_to_ptr.vmem [resolvable:$true] %s498_s26 }
  0x9e   : > { %734 = vmatpush3.bf16.msra.mxu0 %v733_v5  ;;  %v389_v10 = vld [vmem:[#allocation8] sm:$0xff]  ;;  %v390_v11 = vld [vmem:[#allocation8 + $0x8] sm:$0xff]  ;;  %v739_v14 = vpack.c.bf16 %v300_v9, %v299_v8  ;;  %v302_v17 = vld [vmem:[#allocation5 + $0x38] sm:$0xff]  ;;  %v760_v18 = vpack.c.bf16 %v392_v13, %v391_v12  ;;  %s485_s8 = scalar_lea.sflag [#allocation4], %s1348_s11  ;;  %s1014_s14 = scalar_lea.vmem %s1393_s26, 128 }
  0x9f   : > { %735 = vmatprep.subr.bf16.mxu0 %v1097_v0  ;;  %v757_v15 = vpack.c.bf16 %v390_v11, %v389_v10  ;;  %v301_v16 = vld [vmem:[#allocation5 + $0x30] sm:$0xff]  ;;  %v393_v19 = vld [vmem:[#allocation8 + $0x20] sm:$0xff]  ;;  %v396_v26 = vld [vmem:[#allocation8 + $0x38] sm:$0xff]  ;;  %p1015_p6 = scmp.ne.s32.totalorder %s1393_s26, %s1014_s14  ;;  %p1458_p5 = scmp.ne.s32.totalorder %s1450_s23, 0 }
  0xa0   : > { %v394_v20 = vld [vmem:[#allocation8 + $0x28] sm:$0xff]  ;;  %v742_v21 = vpack.c.bf16 %v302_v17, %v301_v16  ;;  %v303_v22 = vld [vmem:[#allocation5 + $0x40] sm:$0xff]  ;;  %v395_v25 = vld [vmem:[#allocation8 + $0x30] sm:$0xff]  ;;  %s1100_s24 = smov [#allocation11]  }
  0xa1   : > { %758 = vmatpush3.bf16.msra.mxu1 %v757_v15  ;;  %v304_v23 = vld [vmem:[#allocation5 + $0x48] sm:$0xff]  ;;  %v763_v24 = vpack.c.bf16 %v394_v20, %v393_v19  ;;  %v305_v28 = vld [vmem:[#allocation5 + $0x50] sm:$0xff]  ;;  %v306_v29 = vld [vmem:[#allocation5 + $0x58] sm:$0xff]  ;;  %v766_v30 = vpack.c.bf16 %v396_v26, %v395_v25  ;;  %p1016_p7 = pnand %p1015_p6, %p1458_p5  ;;  %s1018_s10 = sshll.u32 %s1100_s24, 4  ;;  %s1019_s10 = int_to_ptr.vmem [resolvable:$false] %s1018_s10 }
  0xa2   : > { %737 = vmatpush3.bf16.msra.mxu0 %v736_v7  ;;  %759 = vmatprep.subr.bf16.mxu1 %v1097_v0  ;;  %v745_v27 = vpack.c.bf16 %v304_v23, %v303_v22  ;;  %v397_v31 = vld [vmem:[#allocation8 + $0x40] sm:$0xff]  ;;  %v398_v32 = vld [vmem:[#allocation8 + $0x48] sm:$0xff]  ;;  %v748_v33 = vpack.c.bf16 %v306_v29, %v305_v28  ;;  %v399_v37 = vld [vmem:[#allocation8 + $0x50] sm:$0xff]  ;;  %s1020_s17 = scalar_lea.vmem %s1019_s10, 256  ;;  %p1021_p12 = scmp.lt.s32.totalorder %s1393_s26, %s1019_s10 }
  0xa3   : > { %738 = vmatprep.subr.bf16.mxu0 %v1097_v0  ;;  %v307_v34 = vld [vmem:[#allocation5 + $0x60] sm:$0xff]  ;;  %v308_v35 = vld [vmem:[#allocation5 + $0x68] sm:$0xff]  ;;  %v769_v36 = vpack.c.bf16 %v398_v32, %v397_v31  ;;  %v309_v40 = vld [vmem:[#allocation5 + $0x70] sm:$0xff]  ;;  %p1017_p9 = pneg %p1016_p7  ;;  %p1022_p3 = scmp.lt.s32.totalorder %s1020_s17, %s1014_s14 }
  0xa4   : > { %v400_v38 = vld [vmem:[#allocation8 + $0x58] sm:$0xff]  ;;  %v751_v39 = vpack.c.bf16 %v308_v35, %v307_v34  ;;  %v401_v43 = vld [vmem:[#allocation8 + $0x60] sm:$0xff]  ;;  %v402_v44 = vld [vmem:[#allocation8 + $0x68] sm:$0xff] }
  0xa5   : > { %761 = vmatpush3.bf16.msra.mxu1 %v760_v18  ;;  %v310_v41 = vld [vmem:[#allocation5 + $0x78] sm:$0xff]  ;;  %v772_v42 = vpack.c.bf16 %v400_v38, %v399_v37  ;;  %v775_v46 = vpack.c.bf16 %v402_v44, %v401_v43  ;;  %v622_v51 = vld [vmem:[#allocation7] ss:$0 sm:$0xff]  ;;  %v623_v56 = vld [vmem:[#allocation10] ss:$0 sm:$0xff]  ;;  %p1023_p13 = por %p1022_p3, %p1021_p12 }
  0xa6   : > { %740 = vmatpush3.bf16.msra.mxu0 %v739_v14  ;;  %762 = vmatprep.subr.bf16.mxu1 %v1097_v0  ;;  %v754_v45 = vpack.c.bf16 %v310_v41, %v309_v40  ;;  %v294_v47 = vld [vmem:[%s1354_s13] sm:$0xff] }
  0xa7   : > { %741 = vmatprep.subr.bf16.mxu0 %v1097_v0  ;;  %v403_v48 = vld [vmem:[#allocation8 + $0x70] sm:$0xff]  ;;  %v404_v49 = vld [vmem:[#allocation8 + $0x78] sm:$0xff]  ;;  %p1024_p0 = pnand %p1023_p13, %p1017_p9 }
  0xa8   : > { %v778_v50 = vpack.c.bf16 %v404_v49, %v403_v48 }
  0xa9   : > { %764 = vmatpush3.bf16.msra.mxu1 %v763_v24 }
  0xaa   : > { %743 = vmatpush3.bf16.msra.mxu0 %v742_v21  ;;  %765 = vmatprep.subr.bf16.mxu1 %v1097_v0 }
  0xab   : > { %744 = vmatprep.subr.bf16.mxu0 %v1097_v0 }
  0xad   : > { %767 = vmatpush3.bf16.msra.mxu1 %v766_v30 }
  0xae   : > { %746 = vmatpush3.bf16.msra.mxu0 %v745_v27  ;;  %768 = vmatprep.subr.bf16.mxu1 %v1097_v0 }
  0xaf   : > { %747 = vmatprep.subr.bf16.mxu0 %v1097_v0 }
  0xb1   : > { %770 = vmatpush3.bf16.msra.mxu1 %v769_v36 }
  0xb2   : > { %749 = vmatpush3.bf16.msra.mxu0 %v748_v33  ;;  %771 = vmatprep.subr.bf16.mxu1 %v1097_v0 }
  0xb3   : > { %750 = vmatprep.subr.bf16.mxu0 %v1097_v0 }
  0xb5   : > { %773 = vmatpush3.bf16.msra.mxu1 %v772_v42 }
  0xb6   : > { %752 = vmatpush3.bf16.msra.mxu0 %v751_v39  ;;  %774 = vmatprep.subr.bf16.mxu1 %v1097_v0 }
  0xb7   : > { %753 = vmatprep.subr.bf16.mxu0 %v1097_v0 }
  0xb9   : > { %776 = vmatpush3.bf16.msra.mxu1 %v775_v46 }
  0xba   : > { %755 = vmatpush3.bf16.msra.mxu0 %v754_v45  ;;  %777 = vmatprep.subr.bf16.mxu1 %v1097_v0 }
  0xbd   : > { %695 = vmatmul.mubr.f32.vlgmr.msra.gmra.mrb[0].mxu0 %v294_v47  ;;  %779 = vmatpush3.bf16.msra.mxu1 %v778_v50 }
 0x190   : > { %v384_v52 = vpop.f32.mrb[0].mxu0 }
 0x191   : > { %v385_v53 = vadd.f32 %v622_v51, %v384_v52  ;;  %v696_v54 = vpop.f32.mrb[1].mxu0 }
 0x193   : > { %v388_v55 = vmax.f32 %v385_v53, 0.0 }
 0x195   : > { %730 = vmatmul.mubr.f32.vlgmr.msra.gmra.mrb[0].mxu1 %v388_v55 }
 0x268   : > { %v478_v57 = vpop.f32.mrb[0].mxu1 }
 0x269   : > { %v479_v58 = vadd.f32 %v623_v56, %v478_v57  ;;  %v731_v59 = vpop.f32.mrb[1].mxu1 }
 0x26b   : > { %v482_v60 = vadd.f32 %v479_v58, %v294_v47 }
 0x26d   : > { %483 = vst [vmem:[%s293_s9] sm:$0xff] %v482_v60 }
 0x26e   : > { %1027 = shalt.err (!%p1024_p0)
}
 0x26f   : > { %s1028_s22 = scalar_lea.hbm %s1391_s7, 128  ;;  %s1032_s27 = scalar_lea.hbm %s1440_s5, 256 }
 0x270   : > { %p1029_p2 = scmp.ne.s32.totalorder %s1391_s7, %s1028_s22  ;;  %p1033_p10 = scmp.lt.u32.totalorder %s1391_s7, %s1440_s5 }
 0x271   : > { %p1034_p11 = scmp.lt.u32.totalorder %s1032_s27, %s1028_s22  ;;  %p1036_p6 = scmp.lt.u32.totalorder %s1028_s22, %s1391_s7 }
 0x272   : > { %p1030_p8 = pnand %p1029_p2, %p1458_p5 }
 0x273   : > { %p1035_p1 = por %p1034_p11, %p1033_p10 }
 0x274   : > { %p1031_p4 = pneg %p1030_p8 }
 0x275   : > { %p1037_p7 = por %p1036_p6, %p1035_p1 }
 0x277   : > { %p1038_p9 = pnand %p1037_p7, %p1031_p4 }
 0x279   : > { %1041 = shalt.err (!%p1038_p9)
}
 0x27a   : > { %798 = dma.vmem_to_hbm [thread:$0]  (%p1458_p5), %s1393_s26, 128, %s1391_s7, %s485_s8  }
 0x27b PF: > { %s510_s25 = sand.u32 1, %s1076_s18   ;;  %p1459_p12 = scmp.ne.s32.totalorder %s1451_s12, 0 }
 0x27c   : > { %p1460_p3 = scmp.ge.s32.totalorder %s1088_s21, 2  ;;  %s511_s9 = scalar_lea.sflag [#allocation4], %s510_s25 }
 0x27e   : > { %p818_p13 = pnand %p1460_p3, %p1459_p12 }
 0x280   : > { %1071 = dma.done.wait (!%p818_p13), %s511_s9, 128  }
 0x281   : > { %1073 = vsyncadd (!%p818_p13), %s511_s9, 4294967168  ;;  %p20_p0 = scmp.ge.s32.totalorder %s1272_s28, 4   ;;  %s1461_s18 = smov %s1080_s19 }
 0x282   : > { %s1462_s19 = smov %s1084_s20  ;;  %s1463_s20 = smov %s1283_s16 }
 0x283   : > { %s1464_s21 = smov %s1272_s28  ;;  %22 = sbr.rel (!%p20_p0) target bundleno = 7 (0x7), region = 101 }
 0x28a   :  { %516 = vsyncpa [#allocation3], 1 }
 0x28b   :  { %518 = vsyncpa [#allocation3 + $0x1], 1 }
 0x28c   :  { %519 = vsyncpa [#allocation6], 1 }
 0x28d   :  { %520 = vsyncpa [#allocation9], 1 }
 0x28e   :  { %521 = vsyncpa [#allocation4], 1 }
 0x28f   :  { %523 = vsyncpa [#allocation4 + $0x1], 1 }

</bundles_post_ra>
